<compile_context>
chip_gen: v7x
topology: tpu7x:2x2x1
jax: 0.10.0
libtpu: 0.0.40
codegen_flags: <defaults>
</compile_context>

<pallas_src>
import jax
import jax.numpy as jnp
from jax.experimental import pallas as pl
from jax.experimental.pallas import tpu as pltpu


# ----------------------------------------------------------------------------
# Kernel
# ----------------------------------------------------------------------------
def aff_kernel(x_ref, r_ref, xg_ref, w1_ref, b1_ref, w2_ref, b2_ref, o_ref):
    """One (batch, spatial-tile) step of the AFF forward.

    x_ref, r_ref, o_ref : (TILE_S, LANES) f32   LANES = P*C lane-packed pixels
    xg_ref              : (1, LANES)      f32   hoisted global branch (per batch)
    w1_ref              : (LANES, P*Cm)   bf16  local conv1 (+BN), block-diag over P
    b1_ref              : (1, P*Cm)       f32
    w2_ref              : (P*Cm, LANES)   bf16  local conv2 (+BN), block-diag over P
    b2_ref              : (1, LANES)      f32
    """
    x = x_ref[...]
    r = r_ref[...]
    xa = x + r

    # Local attention: conv1+BN -> ReLU -> conv2+BN (bf16 MXU, f32 accumulate).
    h = jnp.dot(xa.astype(jnp.bfloat16), w1_ref[...],
                preferred_element_type=jnp.float32) + b1_ref[...]
    h = jnp.maximum(h, 0.0)
    xl = jnp.dot(h.astype(jnp.bfloat16), w2_ref[...],
                 preferred_element_type=jnp.float32) + b2_ref[...]

    # Add hoisted global branch (per-batch broadcast), sigmoid (EUP), fuse.
    wei = jax.nn.sigmoid(xl + xg_ref[...])
    # 2*x*wei + 2*r*(1-wei) == 2*(r + (x - r)*wei)   (fewer VALU ops)
    o_ref[...] = 2.0 * (r + (x - r) * wei)


# ----------------------------------------------------------------------------
# Wrapper helpers
# ----------------------------------------------------------------------------
def _vmem_limit_bytes():
    """Generation-aware scoped-VMEM limit (v5e/v6e: 128 MiB phys, v7x: 64 MiB)."""
    try:
        cap = int(pltpu.get_tpu_info().vmem_capacity_bytes)
    except Exception:  # interpret mode / API drift: assume the small chip
        cap = 64 << 20
    return int(min(cap * 3 // 4, 96 << 20))


def _auto_tile_s(S, lanes):
    """Largest spatial tile (slab rows) that keeps x/r/out double-buffered plus
    f32 intermediates comfortably under the scoped-VMEM budget."""
    budget = _vmem_limit_bytes() // 2
    bytes_per_row = lanes * 4 * (3 * 2 + 3)  # 3 I/O arrays x 2 buffers + temps
    t = min(S, max(8, budget // bytes_per_row), 2048)
    t = max(8, (t // 8) * 8)
    while t > 8 and S % t:
        t -= 8
    if S % t:
        t = S  # tiny / ragged S: one full block (block == full dim is legal)
    return int(t)


def _block_diag(w, p):
    """Block-diagonal stack of `p` copies of `w`: (k, n) -> (p*k, p*n)."""
    if p == 1:
        return w
    k, n = w.shape
    out = jnp.zeros((p * k, p * n), w.dtype)
    for i in range(p):
        out = out.at[i * k:(i + 1) * k, i * n:(i + 1) * n].set(w)
    return out


# ----------------------------------------------------------------------------
# Forward pass (NHWC entry point + NCHW interface shim)
# ----------------------------------------------------------------------------
def aff_pallas_nhwc(x, residual, params, *, tile_s=None):
    """AFF forward. x, residual: (B, H, W, C) float32. Returns (B, H, W, C) f32.

    `params` holds the eval-mode Conv1x1+BatchNorm folded affines (see
    make_aff_params).  `tile_s` optionally overrides the spatial tile (counted
    in lane-packed slab rows); it must divide HW // P.
    """
    B, H, W, C = x.shape
    HW = H * W
    Cm = params["lw1"].shape[1]

    # ---- global attention branch, hoisted out of the kernel (O(B*C) work) ---
    g = jnp.mean(x + residual, axis=(1, 2))                       # (B, C) f32
    xg = jnp.maximum(g @ params["gw1"] + params["gb1"], 0.0)
    xg = xg @ params["gw2"] + params["gb2"]                       # (B, C) f32

    # ---- lane packing: P pixels per 128-lane row when C < 128 ---------------
    if C % 128 == 0:
        P = 1
    elif 128 % C == 0 and HW % (128 // C) == 0:
        P = 128 // C
    else:
        P = 1  # TODO(synk): zero-pad C to a multiple of 128 for lane-dense stores
    lanes = P * C
    S = HW // P

    xs = x.reshape(B, S, lanes)            # pure views: NHWC is channel-minor
    rs = residual.reshape(B, S, lanes)
    xg_t = jnp.tile(xg, (1, P)).reshape(B, 1, lanes)

    # Local-branch 1x1 convs (+BN) as block-diagonal matmuls over packed rows.
    w1s = _block_diag(params["lw1"], P).astype(jnp.bfloat16)      # (lanes, P*Cm)
    b1s = jnp.tile(params["lb1"], (1, P))                         # (1, P*Cm) f32
    w2s = _block_diag(params["lw2"], P).astype(jnp.bfloat16)      # (P*Cm, lanes)
    b2s = jnp.tile(params["lb2"], (1, P))                         # (1, lanes) f32

    if tile_s is None:
        tile_s = _auto_tile_s(S, lanes)
    if S % tile_s:
        raise ValueError(f"tile_s={tile_s} must divide packed spatial size S={S}")

    grid = (B, S // tile_s)
    act_spec = pl.BlockSpec((None, tile_s, lanes), lambda b, t: (b, t, 0))
    out_spec = pl.BlockSpec((None, tile_s, lanes), lambda b, t: (b, t, 0))
    # TODO(synk): for very large C, pin the weight/bias specs with
    # pipeline_mode=pl.Buffered(1) to reclaim their double-buffer VMEM.
    const2 = lambda shape: pl.BlockSpec(shape, lambda b, t: (0, 0))

    out = pl.pallas_call(
        aff_kernel,
        out_shape=jax.ShapeDtypeStruct((B, S, lanes), jnp.float32),
        grid_spec=pltpu.PrefetchScalarGridSpec(
            num_scalar_prefetch=0,
            grid=grid,
            in_specs=[
                act_spec,                                                # x
                act_spec,                                                # residual
                pl.BlockSpec((None, 1, lanes), lambda b, t: (b, 0, 0)),  # xg per batch
                const2((lanes, P * Cm)),                                 # w1 slab
                const2((1, P * Cm)),                                     # b1 slab
                const2((P * Cm, lanes)),                                 # w2 slab
                const2((1, lanes)),                                      # b2 slab
            ],
            out_specs=out_spec,
        ),
        compiler_params=pltpu.CompilerParams(
            dimension_semantics=("parallel", "parallel"),
            vmem_limit_bytes=_vmem_limit_bytes(),
        ),
        cost_estimate=pl.CostEstimate(
            flops=int(B * HW * (4 * C * Cm + 10 * C)),
            transcendentals=int(B * HW * C),
            bytes_accessed=int(12 * B * HW * C),
        ),
    )(xs, rs, xg_t, w1s, b1s, w2s, b2s)

    return out.reshape(B, H, W, C)


def aff_pallas_nchw(x_nchw, res_nchw, params, *, tile_s=None):
    """Interface shim only (the PyTorch module is NCHW).  In production keep
    activations NHWC end-to-end and call aff_pallas_nhwc directly — the kernel
    is HBM-bound and these transposes are an extra HBM round trip."""
    x = jnp.transpose(x_nchw, (0, 2, 3, 1))
    r = jnp.transpose(res_nchw, (0, 2, 3, 1))
    out = aff_pallas_nhwc(x, r, params, tile_s=tile_s)
    return jnp.transpose(out, (0, 3, 1, 2))


# ----------------------------------------------------------------------------
# Parameters: Conv2d(k=1) + BatchNorm2d (eval mode) folded into y = x @ W + b.
# ----------------------------------------------------------------------------
def _fold_conv_bn(key, c_in, c_out, eps=1e-5):
    k1, k2, k3, k4, k5, k6 = jax.random.split(key, 6)
    w = jax.random.normal(k1, (c_in, c_out), jnp.float32) * (1.0 / jnp.sqrt(c_in))
    b = jax.random.normal(k2, (c_out,), jnp.float32) * 0.1
    gamma = 1.0 + 0.1 * jax.random.normal(k3, (c_out,), jnp.float32)
    beta = 0.1 * jax.random.normal(k4, (c_out,), jnp.float32)
    run_mean = 0.1 * jax.random.normal(k5, (c_out,), jnp.float32)
    run_var = jnp.abs(1.0 + 0.1 * jax.random.normal(k6, (c_out,), jnp.float32))
    scale = gamma / jnp.sqrt(run_var + eps)
    w_eff = w * scale[None, :]
    b_eff = (b - run_mean) * scale + beta
    return w_eff, b_eff.reshape(1, c_out)


def make_aff_params(key, channels=64, r=4):
    cm = int(channels // r)
    k = jax.random.split(key, 4)
    lw1, lb1 = _fold_conv_bn(k[0], channels, cm)
    lw2, lb2 = _fold_conv_bn(k[1], cm, channels)
    gw1, gb1 = _fold_conv_bn(k[2], channels, cm)
    gw2, gb2 = _fold_conv_bn(k[3], cm, channels)
    return dict(lw1=lw1, lb1=lb1, lw2=lw2, lb2=lb2,
                gw1=gw1, gb1=gb1, gw2=gw2, gb2=gb2)


# Pure-JAX f32 reference (same BN-eval-folded semantics as the module).
def aff_reference(x_nchw, res_nchw, p):
    B, C, H, W = x_nchw.shape
    x = jnp.transpose(x_nchw, (0, 2, 3, 1)).reshape(B, H * W, C)
    r = jnp.transpose(res_nchw, (0, 2, 3, 1)).reshape(B, H * W, C)
    xa = x + r
    xl = jnp.maximum(xa @ p["lw1"] + p["lb1"], 0.0) @ p["lw2"] + p["lb2"]
    g = jnp.mean(xa, axis=1, keepdims=True)
    xg = jnp.maximum(g @ p["gw1"] + p["gb1"], 0.0) @ p["gw2"] + p["gb2"]
    wei = jax.nn.sigmoid(xl + xg)
    out = 2.0 * x * wei + 2.0 * r * (1.0 - wei)
    return jnp.transpose(out.reshape(B, H, W, C), (0, 3, 1, 2))


def _check(out, ref, tag):
    assert out.shape == ref.shape, f"{tag}: shape {out.shape} vs {ref.shape}"
    max_err = float(jnp.max(jnp.abs(out - ref)))
    rel_err = float(jnp.mean(jnp.abs(out - ref)) / (jnp.mean(jnp.abs(ref)) + 1e-8))
    # bf16 matmul operands (f32 accumulation) => loosened tolerance vs f32 ref.
    assert max_err < 0.15, f"{tag}: max abs err {max_err}"
    assert rel_err < 0.02, f"{tag}: mean rel err {rel_err}"


if __name__ == "__main__":
    key = jax.random.PRNGKey(0)
    kx, kr, kp = jax.random.split(key, 3)

    B, C, H, W = 2, 64, 16, 16          # module defaults: channels=64, r=4
    x = jax.random.normal(kx, (B, C, H, W), jnp.float32)
    residual = jax.random.normal(kr, (B, C, H, W), jnp.float32)
    params = make_aff_params(kp, channels=C, r=4)

    ref = aff_reference(x, residual, params)

    # 1) auto tile size (generation-aware; single tile per batch at this size)
    out = jax.block_until_ready(aff_pallas_nchw(x, residual, params))
    _check(out, ref, "auto-tile")

    # 2) explicit small tile to exercise the multi-tile (B, S) pipelined grid
    out_tiled = jax.block_until_ready(aff_pallas_nchw(x, residual, params, tile_s=32))
    _check(out_tiled, ref, "tile_s=32")

    print("KERNEL_OK")
</pallas_src>

<mosaic_0001>
module attributes {stable_mosaic.version = 11 : i64} {
  func.func @aff_kernel(%arg0: i32, %arg1: i32, %arg2: memref<1x128x128xf32, #tpu.memory_space<vmem>>, %arg3: memref<1x128x128xf32, #tpu.memory_space<vmem>>, %arg4: memref<1x1x128xf32, #tpu.memory_space<vmem>>, %arg5: memref<128x32xbf16, #tpu.memory_space<vmem>>, %arg6: memref<1x32xf32, #tpu.memory_space<vmem>>, %arg7: memref<32x128xbf16, #tpu.memory_space<vmem>>, %arg8: memref<1x128xf32, #tpu.memory_space<vmem>>, %arg9: memref<1x128x128xf32, #tpu.memory_space<vmem>>) attributes {dimension_semantics = [#tpu.dimension_semantics<parallel>, #tpu.dimension_semantics<parallel>], iteration_bounds = array<i64: 2, 1>, scalar_prefetch = 0 : i64, scratch_operands = 0 : i64, tpu.core_type = #tpu.core_type<tc>, window_params = [{transform_indices = @transform_0, window_bounds = array<i64: 1, 128, 128>}, {transform_indices = @transform_1, window_bounds = array<i64: 1, 128, 128>}, {transform_indices = @transform_2, window_bounds = array<i64: 1, 1, 128>}, {pipeline_mode = #tpu.pipeline_mode<synchronous>, transform_indices = @transform_3, window_bounds = array<i64: 128, 32>}, {pipeline_mode = #tpu.pipeline_mode<synchronous>, transform_indices = @transform_4, window_bounds = array<i64: 1, 32>}, {pipeline_mode = #tpu.pipeline_mode<synchronous>, transform_indices = @transform_5, window_bounds = array<i64: 32, 128>}, {pipeline_mode = #tpu.pipeline_mode<synchronous>, transform_indices = @transform_6, window_bounds = array<i64: 1, 128>}, {transform_indices = @transform_7, window_bounds = array<i64: 1, 128, 128>}]} {
    %c0 = arith.constant 0 : index
    %c0_0 = arith.constant 0 : index
    %c0_1 = arith.constant 0 : index
    %0 = vector.load %arg2[%c0, %c0_0, %c0_1] : memref<1x128x128xf32, #tpu.memory_space<vmem>>, vector<1x128x128xf32>
    %1 = vector.shape_cast %0 : vector<1x128x128xf32> to vector<128x128xf32>
    %c0_2 = arith.constant 0 : index
    %c0_3 = arith.constant 0 : index
    %c0_4 = arith.constant 0 : index
    %2 = vector.load %arg3[%c0_2, %c0_3, %c0_4] : memref<1x128x128xf32, #tpu.memory_space<vmem>>, vector<1x128x128xf32>
    %3 = vector.shape_cast %2 : vector<1x128x128xf32> to vector<128x128xf32>
    %4 = arith.addf %1, %3 : vector<128x128xf32>
    %5 = arith.truncf %4 : vector<128x128xf32> to vector<128x128xbf16>
    %c0_5 = arith.constant 0 : index
    %c0_6 = arith.constant 0 : index
    %6 = vector.load %arg5[%c0_5, %c0_6] : memref<128x32xbf16, #tpu.memory_space<vmem>>, vector<128x32xbf16>
    %cst = arith.constant dense<0.000000e+00> : vector<128x32xf32>
    %7 = tpu.matmul %5, %6, %cst {dimension_numbers = #tpu.dot_dimension_numbers<[1], [0], [0], [1], [0, 0, 1, 1], [], []>} : vector<128x128xbf16>, vector<128x32xbf16>, vector<128x32xf32> -> vector<128x32xf32>
    %c0_7 = arith.constant 0 : index
    %c0_8 = arith.constant 0 : index
    %8 = vector.load %arg6[%c0_7, %c0_8] : memref<1x32xf32, #tpu.memory_space<vmem>>, vector<1x32xf32>
    %9 = vector.broadcast %8 : vector<1x32xf32> to vector<128x32xf32>
    %10 = arith.addf %7, %9 : vector<128x32xf32>
    %cst_9 = arith.constant 0.000000e+00 : f32
    %11 = vector.broadcast %cst_9 : f32 to vector<128x32xf32>
    %12 = arith.maximumf %10, %11 : vector<128x32xf32>
    %13 = arith.truncf %12 : vector<128x32xf32> to vector<128x32xbf16>
    %c0_10 = arith.constant 0 : index
    %c0_11 = arith.constant 0 : index
    %14 = vector.load %arg7[%c0_10, %c0_11] : memref<32x128xbf16, #tpu.memory_space<vmem>>, vector<32x128xbf16>
    %cst_12 = arith.constant dense<0.000000e+00> : vector<128x128xf32>
    %15 = tpu.matmul %13, %14, %cst_12 {dimension_numbers = #tpu.dot_dimension_numbers<[1], [0], [0], [1], [0, 0, 1, 1], [], []>} : vector<128x32xbf16>, vector<32x128xbf16>, vector<128x128xf32> -> vector<128x128xf32>
    %c0_13 = arith.constant 0 : index
    %c0_14 = arith.constant 0 : index
    %16 = vector.load %arg8[%c0_13, %c0_14] : memref<1x128xf32, #tpu.memory_space<vmem>>, vector<1x128xf32>
    %17 = vector.broadcast %16 : vector<1x128xf32> to vector<128x128xf32>
    %18 = arith.addf %15, %17 : vector<128x128xf32>
    %c0_15 = arith.constant 0 : index
    %c0_16 = arith.constant 0 : index
    %c0_17 = arith.constant 0 : index
    %19 = vector.load %arg4[%c0_15, %c0_16, %c0_17] : memref<1x1x128xf32, #tpu.memory_space<vmem>>, vector<1x1x128xf32>
    %20 = vector.shape_cast %19 : vector<1x1x128xf32> to vector<1x128xf32>
    %21 = vector.broadcast %20 : vector<1x128xf32> to vector<128x128xf32>
    %22 = arith.addf %18, %21 : vector<128x128xf32>
    %23 = arith.negf %22 : vector<128x128xf32>
    %24 = math.exp %23 : vector<128x128xf32>
    %cst_18 = arith.constant 1.000000e+00 : f32
    %25 = vector.broadcast %cst_18 : f32 to vector<128x128xf32>
    %26 = arith.addf %25, %24 : vector<128x128xf32>
    %27 = arith.divf %25, %26 : vector<128x128xf32>
    %28 = arith.subf %1, %3 : vector<128x128xf32>
    %29 = arith.mulf %28, %27 : vector<128x128xf32>
    %30 = arith.addf %3, %29 : vector<128x128xf32>
    %cst_19 = arith.constant 2.000000e+00 : f32
    %31 = vector.broadcast %cst_19 : f32 to vector<128x128xf32>
    %32 = arith.mulf %31, %30 : vector<128x128xf32>
    %c0_20 = arith.constant 0 : index
    %c0_21 = arith.constant 0 : index
    %c0_22 = arith.constant 0 : index
    %33 = vector.load %arg9[%c0_20, %c0_21, %c0_22] : memref<1x128x128xf32, #tpu.memory_space<vmem>>, vector<1x128x128xf32>
    %34 = vector.shape_cast %33 : vector<1x128x128xf32> to vector<128x128xf32>
    %35 = vector.shape_cast %32 : vector<128x128xf32> to vector<1x128x128xf32>
    tpu.vector_store %arg9[%c0_20, %c0_21, %c0_22], %35 {strides = array<i32>} : memref<1x128x128xf32, #tpu.memory_space<vmem>>, vector<1x128x128xf32>,
    return
  }
  func.func @transform_0(%arg0: i32, %arg1: i32) -> (i32, i32, i32) {
    %c0_i32 = arith.constant 0 : i32
    %c0_i32_0 = arith.constant 0 : i32
    return %arg0, %arg1, %c0_i32 : i32, i32, i32
  }
  func.func @transform_1(%arg0: i32, %arg1: i32) -> (i32, i32, i32) {
    %c0_i32 = arith.constant 0 : i32
    %c0_i32_0 = arith.constant 0 : i32
    return %arg0, %arg1, %c0_i32 : i32, i32, i32
  }
  func.func @transform_2(%arg0: i32, %arg1: i32) -> (i32, i32, i32) {
    %c0_i32 = arith.constant 0 : i32
    %c0_i32_0 = arith.constant 0 : i32
    %c0_i32_1 = arith.constant 0 : i32
    return %arg0, %c0_i32, %c0_i32_0 : i32, i32, i32
  }
  func.func @transform_3(%arg0: i32, %arg1: i32) -> (i32, i32) {
    %c0_i32 = arith.constant 0 : i32
    %c0_i32_0 = arith.constant 0 : i32
    %c0_i32_1 = arith.constant 0 : i32
    return %c0_i32, %c0_i32_0 : i32, i32
  }
  func.func @transform_4(%arg0: i32, %arg1: i32) -> (i32, i32) {
    %c0_i32 = arith.constant 0 : i32
    %c0_i32_0 = arith.constant 0 : i32
    %c0_i32_1 = arith.constant 0 : i32
    return %c0_i32, %c0_i32_0 : i32, i32
  }
  func.func @transform_5(%arg0: i32, %arg1: i32) -> (i32, i32) {
    %c0_i32 = arith.constant 0 : i32
    %c0_i32_0 = arith.constant 0 : i32
    %c0_i32_1 = arith.constant 0 : i32
    return %c0_i32, %c0_i32_0 : i32, i32
  }
  func.func @transform_6(%arg0: i32, %arg1: i32) -> (i32, i32) {
    %c0_i32 = arith.constant 0 : i32
    %c0_i32_0 = arith.constant 0 : i32
    %c0_i32_1 = arith.constant 0 : i32
    return %c0_i32, %c0_i32_0 : i32, i32
  }
  func.func @transform_7(%arg0: i32, %arg1: i32) -> (i32, i32, i32) {
    %c0_i32 = arith.constant 0 : i32
    %c0_i32_0 = arith.constant 0 : i32
    return %arg0, %arg1, %c0_i32 : i32, i32, i32
  }
}

</mosaic_0001>

<bundles_post_ra>
// kernel: tpu_custom_call.1
= control target key start
LH: loop header
LB: loop body
LE: loop exit
PB: predicated region body
PF: predicated region fallthrough
CT: control target
= control target key end

     0   :  { %s2109_s0 = inlined_call_operand.hbm [shape: f32[2,128,128], index: 0, kind: input, shape index: {}]   ;;  %s2110_s1 = inlined_call_operand.hbm [shape: f32[2,128,128], index: 1, kind: input, shape index: {}]   ;;  %s2111_s2 = inlined_call_operand.vmem [shape: f32[2,1,128], index: 2, kind: input, shape index: {}]   ;;  %s2112_s3 = inlined_call_operand.vmem [shape: bf16[128,32], index: 3, kind: input, shape index: {}]   ;;  %s2113_s4 = inlined_call_operand.vmem [shape: f32[1,32], index: 4, kind: input, shape index: {}]   ;;  %s2114_s5 = inlined_call_operand.vmem [shape: bf16[32,128], index: 5, kind: input, shape index: {}]   ;;  %s2115_s6 = inlined_call_operand.vmem [shape: f32[1,128], index: 6, kind: input, shape index: {}]   ;;  %s2116_s7 = inlined_call_operand.hbm [shape: f32[2,128,128], index: 7, kind: output, shape index: {}]  }
   0x1   :  { %2123 = sst [smem:[#allocation13_spill]] %s2109_s0 }
   0x2   :  { %12 = vsyncpa [#allocation3], 0 }
   0x3   :  { %14 = vsyncpa [#allocation3 + $0x1], 0 }
   0x4   :  { %15 = vsyncpa [#allocation6], 0 }
   0x5   :  { %17 = vsyncpa [#allocation6 + $0x1], 0 }
   0x6   :  { %18 = vsyncpa [#allocation4], 0 }
   0x7   :  { %20 = vsyncpa [#allocation4 + $0x1], 0  ;;  %s1584_s24 = smov 0   ;;  %s1586_s25 = smov 0  }
   0x8   :  { %s1588_s26 = smov 0   ;;  %s1590_s27 = smov 0  }
   0x9   :  { %s1592_s28 = smov 0   ;;  %s1594_s29 = smov 0  }
   0xa LB: > { %s1107_s30 = sadd.s32 4294967295, %s1535_s29   ;;  %s1108_s8 = sadd.s32 4294967294, %s1535_s29   ;;  %s1535_s29 = sphi %s1594_s29, %s26_s29   ;;  %s1531_s28 = sphi %s1592_s28, %s2147_s28   ;;  %s1527_s27 = sphi %s1590_s27, %s2146_s27   ;;  %s1523_s26 = sphi %s1588_s26, %s2145_s26   ;;  %s1519_s25 = sphi %s1586_s25, %s2144_s25   ;;  %s1515_s24 = sphi %s1584_s24, %s2143_s24  }
   0xb   : > { %s38_s9 = sadd.s32 1, %s1531_s28  ;;  %s47_s10 = sadd.s32 1, %s1523_s26 }
   0xc   : > { %p40_p0 = scmp.ge.s32.totalorder %s38_s9, 2  ;;  %p54_p1 = scmp.ne.s32.totalorder %s1523_s26, %s1519_s25 }
   0xd   : > { %p55_p2 = scmp.eq.s32.totalorder %s1535_s29, 0  ;;  %p60_p3 = scmp.ne.s32.totalorder %s1519_s25, %s1515_s24 }
   0xe   : > { %s2149_s9 = smov (%p40_p0, %s38_s9), 0  ;;  %p61_p5 = scmp.eq.s32.totalorder %s1107_s30, 0 }
   0xf   : > { %2124 = sst [smem:[#allocation11_spill]] %s2149_s9  ;;  %p1625_p4 = por %p55_p2, %p54_p1 }
  0x10   : > { %s42_s12 = ssub.s32 %s1531_s28, %s2149_s9  ;;  %p224_p6 = scmp.eq.s32.totalorder %s1107_s30, 1 }
  0x11   : > { %p45_p7 = scmp.eq.s32.totalorder %s42_s12, 0  ;;  %p1631_p8 = por %p61_p5, %p60_p3 }
  0x12   : > { %p1635_p9 = por %p224_p6, %p54_p1  ;;  %p230_p10 = scmp.eq.s32.totalorder %s1108_s8, 1 }
  0x13   : > { %s2126_s13 = scalar_select %p1631_p8, 1, 0 }
  0x14   : > { %s2127_s14 = scalar_select %p1635_p9, 1, 0 }
  0x15   : > { %s1640_s15 = scalar_select %p45_p7, %s1523_s26, %s47_s10  }
  0x16   : > { %p1642_p11 = por %p230_p10, %p60_p3  ;;  %p1261_p13 = scmp.lt.s32.totalorder %s1535_s29, 2 }
  0x17   : > { %2128 = sst [smem:[#allocation12_spill]] %s1640_s15  ;;  %s1649_s17 = sand.u32 1, %s1523_s26  }
  0x18   : > { %s2129_s16 = scalar_select %p1642_p11, 1, 0 }
  0x19   : > { %s2117_s18 = sshll.u32 %s1649_s17, 7  ;;  %s2118_s19 = sshll.u32 %s1531_s28, 11 }
  0x1a   : > { %s2130_s0 = sld [smem:[#allocation13_spill]]  ;;  %s266_s23 = scalar_lea.vmem [#allocation2], %s2117_s18 }
  0x1b   : > { %s275_s30 = sshll.u32 %s266_s23, 4  ;;  %p1666_p0 = pnand %p1261_p13, %p1625_p4  ;;  %s1662_s30 = int_to_ptr.vmem [resolvable:$true] %s275_s30 }
  0x1c   : > { %s263_s10 = scalar_lea.sflag [#allocation3], %s1649_s17 }
  0x1d   : > { %p1391_p3 = pneg %p1666_p0 }
  0x20   : > { %s1658_s22 = scalar_lea.hbm %s2130_s0, %s2118_s19  ;;  %s1394_s11 = scalar_lea.hbm %s2130_s0, 4096 }
  0x21   : > { %s1389_s12 = scalar_lea.hbm %s1658_s22, 2048  ;;  %p1395_p4 = scmp.lt.u32.totalorder %s1658_s22, %s2130_s0 }
  0x22   : > { %p1390_p2 = scmp.ne.s32.totalorder %s1658_s22, %s1389_s12  ;;  %p1396_p7 = scmp.lt.u32.totalorder %s1394_s11, %s1389_s12 }
  0x23   : > { %p1398_p13 = scmp.lt.u32.totalorder %s1389_s12, %s1658_s22 }
  0x24   : > { %p1392_p5 = pnand %p1391_p3, %p1390_p2  ;;  %p1397_p10 = por %p1396_p7, %p1395_p4 }
  0x26   : > { %p1393_p6 = pneg %p1392_p5  ;;  %p1399_p12 = por %p1398_p13, %p1397_p10 }
  0x28   : > { %p1400_p1 = pnand %p1399_p12, %p1393_p6 }
  0x2a   : > { %1403 = shalt.err (!%p1400_p1)
}
  0x2b   : > { %s1404_s19 = scalar_lea.vmem %s1662_s30, 2048  ;;  %s1537_s20 = smov [#allocation2]  }
  0x2c   : > { %p1405_p2 = scmp.ne.s32.totalorder %s1662_s30, %s1404_s19  ;;  %s1409_s21 = sshll.u32 %s1537_s20, 4  ;;  %s1410_s21 = int_to_ptr.vmem [resolvable:$false] %s1409_s21 }
  0x2d   : > { %s1411_s18 = scalar_lea.vmem %s1410_s21, 4096  ;;  %p1412_p9 = scmp.lt.s32.totalorder %s1662_s30, %s1410_s21 }
  0x2e   : > { %p1407_p5 = pnand %p1405_p2, %p1391_p3  ;;  %p1413_p4 = scmp.lt.s32.totalorder %s1411_s18, %s1404_s19 }
  0x30   : > { %p1408_p11 = pneg %p1407_p5  ;;  %p1414_p7 = por %p1413_p4, %p1412_p9 }
  0x32   : > { %p1415_p10 = pnand %p1414_p7, %p1408_p11 }
  0x34   : > { %1418 = shalt.err (!%p1415_p10)
}
  0x35   : > { %s2121_s12 = smov 128   ;;  %s1539_s11 = smov 8  }
  0x36   : > { %1253 = dma.hbm_to_vmem [thread:$0]  (!%p1666_p0), %s1658_s22, 2048, %s1662_s30, %s263_s10, %s2121_s12, %s2121_s12, %s1539_s11  }
  0x37   : > { %p312_p9 = scmp.lt.s32.totalorder %s1535_s29, 3  ;;  %s2132_s19 = sshll.u32 %s1531_s28, 11 }
  0x38   : > { %s1708_s21 = scalar_lea.hbm %s2110_s1, %s2132_s19  ;;  %p2133_p11 = scmp.ge.s32.totalorder %s1535_s29, 1 }
  0x39   : > { %s2135_s0 = sshll.u32 %s1649_s17, 7  ;;  %s286_s22 = scalar_lea.sflag [#allocation6], %s1649_s17 }
  0x3a   : > { %p1712_p12 = pnand %p2133_p11, %p312_p9  ;;  %s289_s9 = scalar_lea.vmem [#allocation5], %s2135_s0 }
  0x3b   : > { %s298_s15 = sshll.u32 %s289_s9, 4  ;;  %s1419_s30 = scalar_lea.hbm %s1708_s21, 2048  ;;  %s1718_s15 = int_to_ptr.vmem [resolvable:$true] %s298_s15 }
  0x3c   : > { %p1420_p1 = scmp.ne.s32.totalorder %s1708_s21, %s1419_s30  ;;  %s1424_s23 = scalar_lea.hbm %s2110_s1, 4096 }
  0x3d   : > { %p1425_p2 = scmp.lt.u32.totalorder %s1708_s21, %s2110_s1  ;;  %p1426_p5 = scmp.lt.u32.totalorder %s1424_s23, %s1419_s30 }
  0x3e   : > { %p1422_p6 = pnand %p1420_p1, %p1391_p3  ;;  %p1428_p7 = scmp.lt.u32.totalorder %s1419_s30, %s1708_s21 }
  0x3f   : > { %p1427_p4 = por %p1426_p5, %p1425_p2 }
  0x40   : > { %p1423_p13 = pneg %p1422_p6 }
  0x41   : > { %p1429_p10 = por %p1428_p7, %p1427_p4 }
  0x43   : > { %p1430_p9 = pnand %p1429_p10, %p1423_p13 }
  0x45   : > { %1433 = shalt.err (!%p1430_p9)
}
  0x46   : > { %s1434_s0 = scalar_lea.vmem %s1718_s15, 2048  ;;  %s1540_s9 = smov [#allocation5]  }
  0x47   : > { %p1435_p11 = scmp.ne.s32.totalorder %s1718_s15, %s1434_s0  ;;  %s1439_s10 = sshll.u32 %s1540_s9, 4  ;;  %s1440_s10 = int_to_ptr.vmem [resolvable:$false] %s1439_s10 }
  0x48   : > { %s1441_s12 = scalar_lea.vmem %s1440_s10, 4096  ;;  %p1442_p8 = scmp.lt.s32.totalorder %s1718_s15, %s1440_s10 }
  0x49   : > { %p1437_p1 = pnand %p1435_p11, %p1391_p3  ;;  %p1443_p2 = scmp.lt.s32.totalorder %s1441_s12, %s1434_s0 }
  0x4b   : > { %p1438_p6 = pneg %p1437_p1  ;;  %p1444_p5 = por %p1443_p2, %p1442_p8 }
  0x4d   : > { %p1445_p4 = pnand %p1444_p5, %p1438_p6 }
  0x4f   : > { %1448 = shalt.err (!%p1445_p4)
}
  0x50   : > { %s2136_s30 = smov 128   ;;  %316 = sbr.rel (%p1712_p12) target bundleno = 636 (0x27c), region = 48 }
  0x51   : > { %1256 = dma.hbm_to_vmem [thread:$0]  (!%p1666_p0), %s1708_s21, 2048, %s1718_s15, %s286_s22, %s2136_s30, %s2136_s30, %s1539_s11  }
  0x52   : > { %s1752_s19 = sand.u32 (!%p1712_p12), 1, %s1519_s25   ;;  %p2137_p8 = scmp.ne.s32.totalorder (!%p1712_p12), %s2126_s13, 0 }
  0x53   : > { %s1755_s23 = sshll.u32 (!%p1712_p12), %s1752_s19, 7  ;;  %s319_s8 = scalar_lea.sflag (!%p1712_p12), [#allocation3], %s1752_s19 }
  0x54   : > { %s1759_s20 = scalar_lea.vmem (!%p1712_p12), [#allocation2], %s1755_s23 }
  0x57   : > { %1502 = dma.done.wait (%p2137_p8), %s319_s8, 2048  }
  0x58   : > { %1504 = vsyncadd (%p2137_p8), %s319_s8, 4294965248  ;;  %s328_s15 = scalar_lea.sflag [#allocation6], %s1752_s19  ;;  %s1767_s17 = scalar_lea.vmem [#allocation5], %s1755_s23 }
  0x59   : > { %1506 = dma.done.wait (%p2137_p8), %s328_s15, 2048  }
  0x5a   : > { %1508 = vsyncadd (%p2137_p8), %s328_s15, 4294965248  ;;  %v1315_v0 = vld [vmem:[%s2112_s3] sm:$0xff]   ;;  %v1316_v1 = vld [vmem:[%s2112_s3 + $0x8] sm:$0xff]   ;;  %vm648_vm0 = vcmask 261120   ;;  %p372_p0 = scmp.lt.s32.totalorder %s1527_s27, 1  ;;  %s2005_s18 = scalar_lea.vmem [#allocation7], %s1755_s23 }
  0x5b   : > { %1192 = vmatprep.subr.bf16.mxu0 %v1315_v0  ;;  %v1317_v2 = vld [vmem:[%s2112_s3 + $0x10] sm:$0xff]   ;;  %v1318_v3 = vld [vmem:[%s2112_s3 + $0x18] sm:$0xff]   ;;  %v1786_v4 = vld [vmem:[%s1759_s20] sm:$0xff]  ;;  %s1165_s23 = sshll.u32 %s1527_s27, 11  ;;  %s985_s22 = sshll.u32 %s2005_s18, 4  ;;  %s2057_s22 = int_to_ptr.vmem [resolvable:$true] %s985_s22 }
  0x5c   : > { %1193 = vmatpush3.bf16.msra.mxu0 %v1315_v0  ;;  %v1789_v5 = vld [vmem:[%s1759_s20 + $0x8] sm:$0xff]  ;;  %v1792_v6 = vld [vmem:[%s1767_s17] sm:$0xff]  ;;  %v1321_v13 = vld [vmem:[%s2112_s3 + $0x30] sm:$0xff]   ;;  %s373_s12 = scalar_select %p372_p0, %s1527_s27, 1 }
  0x5d   : > { %1194 = vmatprep.subr.bf16.mxu0 %v1316_v1  ;;  %v1795_v7 = vld [vmem:[%s1767_s17 + $0x8] sm:$0xff]  ;;  %v409_v8 = vadd.f32 %v1792_v6, %v1786_v4  ;;  %v1319_v10 = vld [vmem:[%s2112_s3 + $0x20] sm:$0xff]   ;;  %v1322_v14 = vld [vmem:[%s2112_s3 + $0x38] sm:$0xff]   ;;  %s970_s27 = scalar_lea.sflag [#allocation4], %s1752_s19  ;;  %s1449_s13 = scalar_lea.vmem %s2057_s22, 2048 }
  0x5e   : > { %v410_v9 = vadd.f32 %v1795_v7, %v1789_v5  ;;  %v1320_v12 = vld [vmem:[%s2112_s3 + $0x28] sm:$0xff]   ;;  %v1814_v15 = vld [vmem:[%s1759_s20 + $0x10] sm:$0xff]  ;;  %v1817_v16 = vld [vmem:[%s1759_s20 + $0x18] sm:$0xff]  ;;  %s374_s15 = scalar_lea.vmem %s2111_s2, %s373_s12  ;;  %p1450_p3 = scmp.ne.s32.totalorder %s2057_s22, %s1449_s13 }
  0x5f   : > { %v1820_v17 = vld [vmem:[%s1767_s17 + $0x10] sm:$0xff]  ;;  %v1823_v18 = vld [vmem:[%s1767_s17 + $0x18] sm:$0xff]  ;;  %v1826_v19 = vld [vmem:[%s1759_s20 + $0x20] sm:$0xff]  ;;  %p2138_p12 = scmp.ne.s32.totalorder %s2127_s14, 0 }
  0x60   : > { %1195 = vmatpush3.bf16.msra.mxu0 %v1316_v1  ;;  %v425_v11 = vpack.c.bf16 %v410_v9, %v409_v8  ;;  %v1829_v20 = vld [vmem:[%s1759_s20 + $0x28] sm:$0xff]  ;;  %v1832_v21 = vld [vmem:[%s1767_s17 + $0x20] sm:$0xff]  ;;  %v411_v23 = vadd.f32 %v1820_v17, %v1814_v15  ;;  %v412_v24 = vadd.f32 %v1823_v18, %v1817_v16  ;;  %v1846_v28 = vld [vmem:[%s1759_s20 + $0x30] sm:$0xff] }
  0x61   : > { %1196 = vmatprep.subr.bf16.mxu0 %v1317_v2  ;;  %v1835_v22 = vld [vmem:[%s1767_s17 + $0x28] sm:$0xff]  ;;  %v413_v25 = vadd.f32 %v1832_v21, %v1826_v19  ;;  %v1849_v29 = vld [vmem:[%s1759_s20 + $0x38] sm:$0xff]  ;;  %v1852_v31 = vld [vmem:[%s1767_s17 + $0x30] sm:$0xff]  ;;  %p1451_p13 = pnand %p1450_p3, %p2138_p12 }
  0x62   : > { %1208 = vmatprep.mubr.bf16.mxu0 %v425_v11  ;;  %v414_v26 = vadd.f32 %v1835_v22, %v1829_v20  ;;  %v426_v27 = vpack.c.bf16 %v412_v24, %v411_v23  ;;  %v1855_v32 = vld [vmem:[%s1767_s17 + $0x38] sm:$0xff]  ;;  %v1858_v33 = vld [vmem:[%s1759_s20 + $0x40] sm:$0xff]  ;;  %v1861_v34 = vld [vmem:[%s1759_s20 + $0x48] sm:$0xff]  ;;  %v415_v37 = vadd.f32 %v1852_v31, %v1846_v28 }
  0x63   : > { %v1864_v35 = vld [vmem:[%s1767_s17 + $0x40] sm:$0xff]  ;;  %v1867_v36 = vld [vmem:[%s1767_s17 + $0x48] sm:$0xff]  ;;  %v416_v38 = vadd.f32 %v1855_v32, %v1849_v29  ;;  %v1878_v42 = vld [vmem:[%s1759_s20 + $0x50] sm:$0xff]  ;;  %p1452_p7 = pneg %p1451_p13 }
  0x64   : > { %1197 = vmatpush3.bf16.msra.mxu0 %v1317_v2  ;;  %v427_v30 = vpack.c.bf16 %v414_v26, %v413_v25  ;;  %v417_v39 = vadd.f32 %v1864_v35, %v1858_v33  ;;  %v418_v40 = vadd.f32 %v1867_v36, %v1861_v34  ;;  %v1881_v43 = vld [vmem:[%s1759_s20 + $0x58] sm:$0xff]  ;;  %v1884_v45 = vld [vmem:[%s1767_s17 + $0x50] sm:$0xff]  ;;  %v1890_v47 = vld [vmem:[%s1759_s20 + $0x60] sm:$0xff] }
  0x65   : > { %1198 = vmatprep.subr.bf16.mxu0 %v1318_v3  ;;  %v428_v41 = vpack.c.bf16 %v416_v38, %v415_v37  ;;  %v1887_v46 = vld [vmem:[%s1767_s17 + $0x58] sm:$0xff]  ;;  %v1893_v48 = vld [vmem:[%s1759_s20 + $0x68] sm:$0xff]  ;;  %v1896_v49 = vld [vmem:[%s1767_s17 + $0x60] sm:$0xff]  ;;  %v419_v51 = vadd.f32 %v1884_v45, %v1878_v42 }
  0x66   : > { %v429_v44 = vpack.c.bf16 %v418_v40, %v417_v39  ;;  %v1899_v50 = vld [vmem:[%s1767_s17 + $0x68] sm:$0xff]  ;;  %v420_v52 = vadd.f32 %v1887_v46, %v1881_v43  ;;  %v421_v53 = vadd.f32 %v1896_v49, %v1890_v47  ;;  %v1910_v56 = vld [vmem:[%s1759_s20 + $0x70] sm:$0xff]  ;;  %v1913_v58 = vld [vmem:[%s1759_s20 + $0x78] sm:$0xff]  ;;  %s2055_s20 = scalar_lea.hbm %s2116_s7, %s1165_s23 }
  0x67   : > { %v422_v54 = vadd.f32 %v1899_v50, %v1893_v48  ;;  %v1916_v59 = vld [vmem:[%s1767_s17 + $0x70] sm:$0xff]  ;;  %v1919_v60 = vld [vmem:[%s1767_s17 + $0x78] sm:$0xff]  ;;  %v1323_v0 = vld [vmem:[%s2114_s5] sm:$0xff]   ;;  %s1541_s17 = smov [#allocation7]  }
  0x68   : > { %1199 = vmatpush3.bf16.msra.mxu0 %v1318_v3  ;;  %v430_v55 = vpack.c.bf16 %v420_v52, %v419_v51  ;;  %v423_v61 = vadd.f32 %v1916_v59, %v1910_v56  ;;  %v424_v62 = vadd.f32 %v1919_v60, %v1913_v58  ;;  %1224 = vmatprep.subr.bf16.mxu1 %v1323_v0  ;;  %v1324_v1 = vld [vmem:[%s2114_s5 + $0x8] sm:$0xff]   ;;  %v1121_v2 = vld [vmem:[%s2113_s4] ss:$0 sm:$0xff]  ;;  %s1453_s10 = sshll.u32 %s1541_s17, 4  ;;  %s1454_s10 = int_to_ptr.vmem [resolvable:$false] %s1453_s10 }
  0x69   : > { %1200 = vmatprep.subr.bf16.mxu0 %v1319_v10  ;;  %v431_v57 = vpack.c.bf16 %v422_v54, %v421_v53  ;;  %1225 = vmatpush3.bf16.msra.mxu1 %v1323_v0  ;;  %s1455_s12 = scalar_lea.vmem %s1454_s10, 4096  ;;  %p1456_p10 = scmp.lt.s32.totalorder %s2057_s22, %s1454_s10 }
  0x6a   : > { %v432_v63 = vpack.c.bf16 %v424_v62, %v423_v61  ;;  %1226 = vmatprep.subr.bf16.mxu1 %v1324_v1  ;;  %p1457_p9 = scmp.lt.s32.totalorder %s1455_s12, %s1449_s13 }
  0x6c   : > { %1201 = vmatpush3.bf16.msra.mxu0 %v1319_v10  ;;  %p1458_p11 = por %p1457_p9, %p1456_p10 }
  0x6d   : > { %1202 = vmatprep.subr.bf16.mxu0 %v1320_v12  ;;  %1227 = vmatpush3.bf16.msra.mxu1 %v1324_v1 }
  0x6e   : > { %p1459_p1 = pnand %p1458_p11, %p1452_p7 }
  0x70   : > { %1203 = vmatpush3.bf16.msra.mxu0 %v1320_v12 }
  0x71   : > { %1204 = vmatprep.subr.bf16.mxu0 %v1321_v13 }
  0x74   : > { %1205 = vmatpush3.bf16.msra.mxu0 %v1321_v13 }
  0x75   : > { %1206 = vmatprep.subr.bf16.mxu0 %v1322_v14 }
  0x78   : > { %1207 = vmatpush3.bf16.msra.mxu0 %v1322_v14 }
  0x7b   : > { %1209 = vmatmul.mubr.bf16.vlgmr.msra.gmra.mrb[0].mxu0 %v426_v27 }
  0x7c   : > { %1212 = vmatprep.mubr.bf16.mxu0 %v427_v30 }
  0x83   : > { %1213 = vmatmul.mubr.bf16.gmra.mrb[4].mxu0 %v428_v41 }
  0x84   : > { %1216 = vmatprep.mubr.bf16.mxu0 %v429_v44 }
  0x8b   : > { %1217 = vmatmul.mubr.bf16.gmra.mrb[8].mxu0 %v430_v55 }
  0x8c   : > { %1220 = vmatprep.mubr.bf16.mxu0 %v431_v57 }
  0x93   : > { %1221 = vmatmul.mubr.bf16.gmra.mrb[12].mxu0 %v432_v63 }
 0x14e   : > { %v1210_v3 = vpop.f32.mrb[0].mxu0 }
 0x14f   : > { %v547_v8 = vadd.f32 %v1210_v3, %v1121_v2  ;;  %v538_v9 = vpop.f32.mrb[1].mxu0 }
 0x150   : > { %v539_v10 = vadd.f32 %v1121_v2, %v538_v9  ;;  %v1211_v11 = vpop.f32.mrb[2].mxu0 }
 0x151   : > { %v550_v12 = vadd.f32 %v1211_v11, %v1121_v2  ;;  %v541_v13 = vpop.f32.mrb[3].mxu0  ;;  %v603_v23 = vmax.f32 %v547_v8, 0.0 }
 0x152   : > { %v542_v14 = vadd.f32 %v1121_v2, %v541_v13  ;;  %v601_v25 = vmax.f32 %v539_v10, 0.0 }
 0x153   : > { %v604_v24 = vmax.f32 %v550_v12, 0.0 }
 0x154   : > { %v602_v26 = vmax.f32 %v542_v14, 0.0 }
 0x155   : > { %v618_v27 = vpack.c.bf16 %v604_v24, %v603_v23 }
 0x156   : > { %v1214_v30 = vpop.f32.mrb[4].mxu0  ;;  %v617_v37 = vpack.c.bf16 %v602_v26, %v601_v25 }
 0x157   : > { %v563_v38 = vadd.f32 %v1214_v30, %v1121_v2  ;;  %v554_v39 = vpop.f32.mrb[5].mxu0 }
 0x158   : > { %v555_v40 = vadd.f32 %v1121_v2, %v554_v39  ;;  %v1215_v41 = vpop.f32.mrb[6].mxu0  ;;  %1228 = vmatprep.mubr.msk.bf16.mxu1 %vm648_vm0, %v617_v37 }
 0x159   : > { %v566_v44 = vadd.f32 %v1215_v41, %v1121_v2  ;;  %v557_v51 = vpop.f32.mrb[7].mxu0  ;;  %1229 = vmatmul.mubr.msk.bf16.vlgmr.msra.gmra.mrb[0].mxu1 %vm648_vm0, %v618_v27  ;;  %v607_v53 = vmax.f32 %v563_v38, 0.0 }
 0x15a   : > { %v558_v52 = vadd.f32 %v1121_v2, %v557_v51  ;;  %v605_v55 = vmax.f32 %v555_v40, 0.0 }
 0x15b   : > { %v608_v54 = vmax.f32 %v566_v44, 0.0 }
 0x15c   : > { %v606_v57 = vmax.f32 %v558_v52, 0.0 }
 0x15d   : > { %v620_v61 = vpack.c.bf16 %v608_v54, %v607_v53 }
 0x15e   : > { %v619_v62 = vpack.c.bf16 %v606_v57, %v605_v55  ;;  %v1218_v63 = vpop.f32.mrb[8].mxu0 }
 0x15f   : > { %v579_v0 = vadd.f32 %v1218_v63, %v1121_v2  ;;  %v570_v1 = vpop.f32.mrb[9].mxu0 }
 0x160   : > { %v571_v3 = vadd.f32 %v1121_v2, %v570_v1  ;;  %v1219_v8 = vpop.f32.mrb[10].mxu0  ;;  %1232 = vmatprep.mubr.msk.bf16.mxu1 %vm648_vm0, %v619_v62 }
 0x161   : > { %v582_v9 = vadd.f32 %v1219_v8, %v1121_v2  ;;  %v573_v10 = vpop.f32.mrb[11].mxu0  ;;  %1233 = vmatmul.mubr.msk.bf16.gmra.mrb[4].mxu1 %vm648_vm0, %v620_v61  ;;  %v611_v12 = vmax.f32 %v579_v0, 0.0  ;;  %v1952_v61 = vld [vmem:[%s374_s15] ss:$0 sm:$0xff] }
 0x162   : > { %v574_v11 = vadd.f32 %v1121_v2, %v573_v10  ;;  %v609_v14 = vmax.f32 %v571_v3, 0.0 }
 0x163   : > { %v612_v13 = vmax.f32 %v582_v9, 0.0 }
 0x164   : > { %v610_v23 = vmax.f32 %v574_v11, 0.0 }
 0x165   : > { %v622_v24 = vpack.c.bf16 %v612_v13, %v611_v12 }
 0x166   : > { %v621_v25 = vpack.c.bf16 %v610_v23, %v609_v14  ;;  %v1222_v26 = vpop.f32.mrb[12].mxu0 }
 0x167   : > { %v595_v27 = vadd.f32 %v1222_v26, %v1121_v2  ;;  %v586_v30 = vpop.f32.mrb[13].mxu0 }
 0x168   : > { %v587_v37 = vadd.f32 %v1121_v2, %v586_v30  ;;  %v1223_v38 = vpop.f32.mrb[14].mxu0  ;;  %1236 = vmatprep.mubr.msk.bf16.mxu1 %vm648_vm0, %v621_v25 }
 0x169   : > { %v598_v39 = vadd.f32 %v1223_v38, %v1121_v2  ;;  %v589_v40 = vpop.f32.mrb[15].mxu0  ;;  %1237 = vmatmul.mubr.msk.bf16.gmra.mrb[8].mxu1 %vm648_vm0, %v622_v24  ;;  %v615_v44 = vmax.f32 %v595_v27, 0.0 }
 0x16a   : > { %v590_v41 = vadd.f32 %v1121_v2, %v589_v40  ;;  %v613_v52 = vmax.f32 %v587_v37, 0.0  ;;  %v1950_v2 = vld [vmem:[%s2115_s6] ss:$0 sm:$0xff] }
 0x16b   : > { %v616_v51 = vmax.f32 %v598_v39, 0.0 }
 0x16c   : > { %v614_v53 = vmax.f32 %v590_v41, 0.0 }
 0x16d   : > { %v624_v54 = vpack.c.bf16 %v616_v51, %v615_v44 }
 0x16e   : > { %v623_v55 = vpack.c.bf16 %v614_v53, %v613_v52 }
 0x170   : > { %1240 = vmatprep.mubr.msk.bf16.mxu1 %vm648_vm0, %v623_v55 }
 0x171   : > { %1241 = vmatmul.mubr.msk.bf16.gmra.mrb[12].mxu1 %vm648_vm0, %v624_v54 }
 0x22c   : > { %v1230_v57 = vpop.f32.mrb[0].mxu1 }
 0x22d   : > { %v716_v62 = vadd.f32 %v1230_v57, %v1950_v2  ;;  %v707_v63 = vpop.f32.mrb[1].mxu1 }
 0x22e   : > { %v708_v0 = vadd.f32 %v1950_v2, %v707_v63  ;;  %v1231_v1 = vpop.f32.mrb[2].mxu1 }
 0x22f   : > { %v779_v3 = vadd.f32 %v1952_v61, %v716_v62  ;;  %v719_v8 = vadd.f32 %v1231_v1, %v1950_v2  ;;  %v710_v9 = vpop.f32.mrb[3].mxu1 }
 0x230   : > { %v777_v10 = vadd.f32 %v1952_v61, %v708_v0  ;;  %v711_v11 = vadd.f32 %v1950_v2, %v710_v9 }
 0x231   : > { %v1144_v12 = vmul.f32 -1.442695, %v779_v3  ;;  %v780_v13 = vadd.f32 %v1952_v61, %v719_v8 }
 0x232   : > { %v1142_v14 = vmul.f32 -1.442695, %v777_v10  ;;  %v778_v23 = vadd.f32 %v1952_v61, %v711_v11 }
 0x233   : > { %1325 = vpow2.f32 %v1144_v12  ;;  %v1145_v24 = vmul.f32 -1.442695, %v780_v13 }
 0x234   : > { %1327 = vpow2.f32 %v1142_v14  ;;  %v1143_v25 = vmul.f32 -1.442695, %v778_v23  ;;  %v1234_v26 = vpop.f32.mrb[4].mxu1 }
 0x235   : > { %1329 = vpow2.f32 %v1145_v24  ;;  %v732_v27 = vadd.f32 %v1234_v26, %v1950_v2  ;;  %v723_v30 = vpop.f32.mrb[5].mxu1 }
 0x236   : > { %1331 = vpow2.f32 %v1143_v25  ;;  %v724_v37 = vadd.f32 %v1950_v2, %v723_v30  ;;  %v1235_v38 = vpop.f32.mrb[6].mxu1 }
 0x237   : > { %v783_v39 = vadd.f32 %v1952_v61, %v732_v27  ;;  %v735_v40 = vadd.f32 %v1235_v38, %v1950_v2  ;;  %v726_v41 = vpop.f32.mrb[7].mxu1 }
 0x238   : > { %v781_v44 = vadd.f32 %v1952_v61, %v724_v37  ;;  %v727_v51 = vadd.f32 %v1950_v2, %v726_v41 }
 0x239   : > { %v1148_v52 = vmul.f32 -1.442695, %v783_v39  ;;  %v784_v53 = vadd.f32 %v1952_v61, %v735_v40 }
 0x23a   : > { %v1146_v54 = vmul.f32 -1.442695, %v781_v44  ;;  %v782_v55 = vadd.f32 %v1952_v61, %v727_v51 }
 0x23b   : > { %1333 = vpow2.f32 %v1148_v52  ;;  %v1149_v57 = vmul.f32 -1.442695, %v784_v53 }
 0x23c   : > { %1335 = vpow2.f32 %v1146_v54  ;;  %v1147_v62 = vmul.f32 -1.442695, %v782_v55  ;;  %v1238_v63 = vpop.f32.mrb[8].mxu1  ;;  %v889_v54 = vsub.f32 %v1786_v4, %v1792_v6  ;;  %v891_v55 = vsub.f32 %v1814_v15, %v1820_v17 }
 0x23d   : > { %v1326_v0 = vpop.eup %1325  ;;  %1337 = vpow2.f32 %v1149_v57  ;;  %v748_v1 = vadd.f32 %v1238_v63, %v1950_v2  ;;  %v739_v3 = vpop.f32.mrb[9].mxu1 }
 0x23e   : > { %v1328_v8 = vpop.eup %1327  ;;  %v843_v9 = vadd.f32 1.0, %v1326_v0  ;;  %1339 = vpow2.f32 %v1147_v62  ;;  %v740_v10 = vadd.f32 %v1950_v2, %v739_v3  ;;  %v1239_v11 = vpop.f32.mrb[10].mxu1  ;;  %v892_v0 = vsub.f32 %v1817_v16, %v1823_v18 }
 0x23f   : > { %v1330_v12 = vpop.eup %1329  ;;  %v841_v13 = vadd.f32 1.0, %v1328_v8  ;;  %v787_v14 = vadd.f32 %v1952_v61, %v748_v1  ;;  %v751_v23 = vadd.f32 %v1239_v11, %v1950_v2  ;;  %v742_v24 = vpop.f32.mrb[11].mxu1 }
 0x240   : > { %v1332_v25 = vpop.eup %1331  ;;  %1341 = vrcp.f32 %v843_v9  ;;  %v844_v26 = vadd.f32 1.0, %v1330_v12  ;;  %v785_v27 = vadd.f32 %v1952_v61, %v740_v10  ;;  %v743_v30 = vadd.f32 %v1950_v2, %v742_v24 }
 0x241   : > { %1343 = vrcp.f32 %v841_v13  ;;  %v842_v37 = vadd.f32 1.0, %v1332_v25  ;;  %v1152_v38 = vmul.f32 -1.442695, %v787_v14  ;;  %v788_v39 = vadd.f32 %v1952_v61, %v751_v23 }
 0x242   : > { %1345 = vrcp.f32 %v844_v26  ;;  %v1150_v40 = vmul.f32 -1.442695, %v785_v27  ;;  %v786_v41 = vadd.f32 %v1952_v61, %v743_v30  ;;  %v890_v27 = vsub.f32 %v1789_v5, %v1795_v7 }
 0x243   : > { %1347 = vrcp.f32 %v842_v37  ;;  %v1153_v44 = vmul.f32 -1.442695, %v788_v39  ;;  %v895_v5 = vsub.f32 %v1846_v28, %v1852_v31 }
 0x244   : > { %1349 = vpow2.f32 %v1152_v38  ;;  %v1151_v51 = vmul.f32 -1.442695, %v786_v41  ;;  %v1242_v52 = vpop.f32.mrb[12].mxu1 }
 0x245   : > { %v1334_v53 = vpop.eup %1333  ;;  %1351 = vpow2.f32 %v1150_v40  ;;  %v764_v57 = vadd.f32 %v1242_v52, %v1950_v2  ;;  %v755_v62 = vpop.f32.mrb[13].mxu1 }
 0x246   : > { %v1336_v63 = vpop.eup %1335  ;;  %v847_v1 = vadd.f32 1.0, %v1334_v53  ;;  %1353 = vpow2.f32 %v1153_v44  ;;  %v756_v3 = vadd.f32 %v1950_v2, %v755_v62  ;;  %v1243_v8 = vpop.f32.mrb[14].mxu1 }
 0x247   : > { %v1338_v9 = vpop.eup %1337  ;;  %v845_v10 = vadd.f32 1.0, %v1336_v63  ;;  %1355 = vpow2.f32 %v1151_v51  ;;  %v791_v4 = vadd.f32 %v1952_v61, %v764_v57  ;;  %v767_v15 = vadd.f32 %v1243_v8, %v1950_v2  ;;  %v758_v11 = vpop.f32.mrb[15].mxu1 }
 0x248   : > { %v1340_v12 = vpop.eup %1339  ;;  %1357 = vrcp.f32 %v847_v1  ;;  %v848_v13 = vadd.f32 1.0, %v1338_v9  ;;  %v789_v14 = vadd.f32 %v1952_v61, %v756_v3  ;;  %v759_v16 = vadd.f32 %v1950_v2, %v758_v11 }
 0x249   : > { %1359 = vrcp.f32 %v845_v10  ;;  %v846_v23 = vadd.f32 1.0, %v1340_v12  ;;  %v1156_v24 = vmul.f32 -1.442695, %v791_v4  ;;  %v792_v25 = vadd.f32 %v1952_v61, %v767_v15 }
 0x24a   : > { %v1342_v26 = vpop.eup %1341  ;;  %1361 = vrcp.f32 %v848_v13  ;;  %v1154_v30 = vmul.f32 -1.442695, %v789_v14  ;;  %v790_v37 = vadd.f32 %v1952_v61, %v759_v16 }
 0x24b   : > { %v1344_v38 = vpop.eup %1343  ;;  %v907_v39 = vmul.f32 %v1342_v26, %v891_v55  ;;  %1363 = vrcp.f32 %v846_v23  ;;  %v1157_v40 = vmul.f32 -1.442695, %v792_v25 }
 0x24c   : > { %v1346_v41 = vpop.eup %1345  ;;  %v905_v44 = vmul.f32 %v1344_v38, %v889_v54  ;;  %1365 = vpow2.f32 %v1156_v24  ;;  %v1155_v2 = vmul.f32 -1.442695, %v790_v37 }
 0x24d   : > { %v1348_v51 = vpop.eup %1347  ;;  %v923_v52 = vadd.f32 %v907_v39, %v1820_v17  ;;  %v908_v53 = vmul.f32 %v1346_v41, %v892_v0  ;;  %1367 = vpow2.f32 %v1154_v30  ;;  %v893_v17 = vsub.f32 %v1826_v19, %v1832_v21 }
 0x24e   : > { %v1350_v57 = vpop.eup %1349  ;;  %v921_v61 = vadd.f32 %v905_v44, %v1792_v6  ;;  %v906_v62 = vmul.f32 %v1348_v51, %v890_v27  ;;  %1369 = vpow2.f32 %v1157_v40  ;;  %v896_v6 = vsub.f32 %v1849_v29, %v1855_v32 }
 0x24f   : > { %v1352_v55 = vpop.eup %1351  ;;  %v939_v63 = vmul.f32 2.0, %v923_v52  ;;  %v924_v54 = vadd.f32 %v908_v53, %v1823_v18  ;;  %v851_v1 = vadd.f32 1.0, %v1350_v57  ;;  %1371 = vpow2.f32 %v1155_v2 }
 0x250   : > { %v1354_v3 = vpop.eup %1353  ;;  %v937_v0 = vmul.f32 2.0, %v921_v61  ;;  %v922_v8 = vadd.f32 %v906_v62, %v1795_v7  ;;  %v849_v9 = vadd.f32 1.0, %v1352_v55  ;;  %v894_v19 = vsub.f32 %v1829_v20, %v1835_v22 }
 0x251   : > { %v1356_v28 = vpop.eup %1355  ;;  %955 = vst [vmem:[%s2005_s18 + $0x10] sm:$0xff] %v939_v63  ;;  %v940_v18 = vmul.f32 2.0, %v924_v54  ;;  %1373 = vrcp.f32 %v851_v1  ;;  %v852_v10 = vadd.f32 1.0, %v1354_v3  ;;  %v899_v39 = vsub.f32 %v1878_v42, %v1884_v45 }
 0x252   : > { %v1358_v4 = vpop.eup %1357  ;;  %953 = vst [vmem:[%s2005_s18] sm:$0xff] %v937_v0  ;;  %v938_v7 = vmul.f32 2.0, %v922_v8  ;;  %1375 = vrcp.f32 %v849_v9  ;;  %v850_v15 = vadd.f32 1.0, %v1356_v28 }
 0x253   : > { %v1360_v11 = vpop.eup %1359  ;;  %956 = vst [vmem:[%s2005_s18 + $0x18] sm:$0xff] %v940_v18  ;;  %v911_v29 = vmul.f32 %v1358_v4, %v895_v5  ;;  %1377 = vrcp.f32 %v852_v10 }
 0x254   : > { %v1362_v12 = vpop.eup %1361  ;;  %954 = vst [vmem:[%s2005_s18 + $0x8] sm:$0xff] %v938_v7  ;;  %v909_v13 = vmul.f32 %v1360_v11, %v893_v17  ;;  %1379 = vrcp.f32 %v850_v15  ;;  %v901_v17 = vsub.f32 %v1890_v47, %v1896_v49 }
 0x255   : > { %v1364_v14 = vpop.eup %1363  ;;  %v927_v16 = vadd.f32 %v911_v29, %v1852_v31  ;;  %v912_v23 = vmul.f32 %v1362_v12, %v896_v6 }
 0x256   : > { %v1366_v24 = vpop.eup %1365  ;;  %v925_v20 = vadd.f32 %v909_v13, %v1832_v21  ;;  %v910_v25 = vmul.f32 %v1364_v14, %v894_v19  ;;  %v897_v21 = vsub.f32 %v1858_v33, %v1864_v35 }
 0x257   : > { %v1368_v26 = vpop.eup %1367  ;;  %v943_v27 = vmul.f32 2.0, %v927_v16  ;;  %v928_v30 = vadd.f32 %v912_v23, %v1855_v32  ;;  %v855_v37 = vadd.f32 1.0, %v1366_v24  ;;  %v900_v32 = vsub.f32 %v1881_v43, %v1887_v46 }
 0x258   : > { %v1370_v38 = vpop.eup %1369  ;;  %v941_v40 = vmul.f32 2.0, %v925_v20  ;;  %v926_v31 = vadd.f32 %v910_v25, %v1835_v22  ;;  %v853_v41 = vadd.f32 1.0, %v1368_v26  ;;  %v898_v22 = vsub.f32 %v1861_v34, %v1867_v36 }
 0x259   : > { %v1372_v44 = vpop.eup %1371  ;;  %959 = vst [vmem:[%s2005_s18 + $0x30] sm:$0xff] %v943_v27  ;;  %v944_v2 = vmul.f32 2.0, %v928_v30  ;;  %1381 = vrcp.f32 %v855_v37  ;;  %v856_v51 = vadd.f32 1.0, %v1370_v38  ;;  %v903_v34 = vsub.f32 %v1910_v56, %v1916_v59 }
 0x25a   : > { %957 = vst [vmem:[%s2005_s18 + $0x20] sm:$0xff] %v941_v40  ;;  %v942_v52 = vmul.f32 2.0, %v926_v31  ;;  %1383 = vrcp.f32 %v853_v41  ;;  %v854_v42 = vadd.f32 1.0, %v1372_v44  ;;  %v902_v56 = vsub.f32 %v1893_v48, %v1899_v50 }
 0x25b   : > { %v1374_v53 = vpop.eup %1373  ;;  %960 = vst [vmem:[%s2005_s18 + $0x38] sm:$0xff] %v944_v2  ;;  %1385 = vrcp.f32 %v856_v51 }
 0x25c   : > { %v1376_v57 = vpop.eup %1375  ;;  %958 = vst [vmem:[%s2005_s18 + $0x28] sm:$0xff] %v942_v52  ;;  %v915_v33 = vmul.f32 %v1374_v53, %v899_v39  ;;  %1387 = vrcp.f32 %v854_v42 }
 0x25d   : > { %v1378_v5 = vpop.eup %1377  ;;  %v913_v61 = vmul.f32 %v1376_v57, %v897_v21 }
 0x25e   : > { %v1380_v62 = vpop.eup %1379  ;;  %v931_v43 = vadd.f32 %v915_v33, %v1884_v45  ;;  %v916_v55 = vmul.f32 %v1378_v5, %v900_v32  ;;  %v904_v45 = vsub.f32 %v1913_v58, %v1919_v60 }
 0x25f   : > { %v929_v63 = vadd.f32 %v913_v61, %v1864_v35  ;;  %v914_v54 = vmul.f32 %v1380_v62, %v898_v22 }
 0x260   : > { %v947_v1 = vmul.f32 2.0, %v931_v43  ;;  %v932_v3 = vadd.f32 %v916_v55, %v1887_v46 }
 0x261   : > { %v945_v0 = vmul.f32 2.0, %v929_v63  ;;  %v930_v8 = vadd.f32 %v914_v54, %v1867_v36 }
 0x262   : > { %963 = vst [vmem:[%s2005_s18 + $0x50] sm:$0xff] %v947_v1  ;;  %v948_v35 = vmul.f32 2.0, %v932_v3 }
 0x263   : > { %v1382_v9 = vpop.eup %1381  ;;  %961 = vst [vmem:[%s2005_s18 + $0x40] sm:$0xff] %v945_v0  ;;  %v946_v28 = vmul.f32 2.0, %v930_v8 }
 0x264   : > { %v1384_v46 = vpop.eup %1383  ;;  %964 = vst [vmem:[%s2005_s18 + $0x58] sm:$0xff] %v948_v35  ;;  %v919_v47 = vmul.f32 %v1382_v9, %v903_v34 }
 0x265   : > { %v1386_v6 = vpop.eup %1385  ;;  %962 = vst [vmem:[%s2005_s18 + $0x48] sm:$0xff] %v946_v28  ;;  %v917_v36 = vmul.f32 %v1384_v46, %v901_v17 }
 0x266   : > { %v1388_v18 = vpop.eup %1387  ;;  %v935_v58 = vadd.f32 %v919_v47, %v1916_v59  ;;  %v920_v10 = vmul.f32 %v1386_v6, %v904_v45 }
 0x267   : > { %v933_v4 = vadd.f32 %v917_v36, %v1896_v49  ;;  %v918_v48 = vmul.f32 %v1388_v18, %v902_v56 }
 0x268   : > { %v951_v19 = vmul.f32 2.0, %v935_v58  ;;  %v936_v7 = vadd.f32 %v920_v10, %v1919_v60 }
 0x269   : > { %v949_v15 = vmul.f32 2.0, %v933_v4  ;;  %v934_v11 = vadd.f32 %v918_v48, %v1899_v50 }
 0x26a   : > { %967 = vst [vmem:[%s2005_s18 + $0x70] sm:$0xff] %v951_v19  ;;  %v952_v29 = vmul.f32 2.0, %v936_v7 }
 0x26b   : > { %965 = vst [vmem:[%s2005_s18 + $0x60] sm:$0xff] %v949_v15  ;;  %v950_v49 = vmul.f32 2.0, %v934_v11 }
 0x26c   : > { %968 = vst [vmem:[%s2005_s18 + $0x78] sm:$0xff] %v952_v29 }
 0x26d   : > { %966 = vst [vmem:[%s2005_s18 + $0x68] sm:$0xff] %v950_v49 }
 0x26e   : > { %1462 = shalt.err (!%p1459_p1)
}
 0x26f   : > { %s1463_s30 = scalar_lea.hbm %s2055_s20, 2048  ;;  %s1467_s11 = scalar_lea.hbm %s2116_s7, 4096 }
 0x270   : > { %p1464_p6 = scmp.ne.s32.totalorder %s2055_s20, %s1463_s30  ;;  %p1468_p4 = scmp.lt.u32.totalorder %s2055_s20, %s2116_s7 }
 0x271   : > { %p1469_p8 = scmp.lt.u32.totalorder %s1467_s11, %s1463_s30  ;;  %p1471_p3 = scmp.lt.u32.totalorder %s1463_s30, %s2055_s20 }
 0x272   : > { %p1465_p2 = pnand %p1464_p6, %p2138_p12 }
 0x273   : > { %p1470_p0 = por %p1469_p8, %p1468_p4 }
 0x274   : > { %p1466_p5 = pneg %p1465_p2 }
 0x275   : > { %p1472_p13 = por %p1471_p3, %p1470_p0 }
 0x277   : > { %p1473_p7 = pnand %p1472_p13, %p1466_p5 }
 0x279   : > { %1476 = shalt.err (!%p1473_p7)
}
 0x27a   : > { %s1542_s23 = smov 128   ;;  %s1543_s0 = smov 8  }
 0x27b   : > { %1248 = dma.vmem_to_hbm [thread:$0]  (%p2138_p12), %s2057_s22, 2048, %s2055_s20, %s970_s27, %s1542_s23, %s1542_s23, %s1543_s0  }
 0x27c PF: > { %s1000_s9 = sand.u32 1, %s1515_s24   ;;  %p2139_p10 = scmp.ne.s32.totalorder %s2129_s16, 0 }
 0x27d   : > { %p2140_p9 = scmp.ge.s32.totalorder %s1535_s29, 2  ;;  %s1001_s13 = scalar_lea.sflag [#allocation4], %s1000_s9 }
 0x27f   : > { %p1258_p11 = pnand %p2140_p9, %p2139_p10 }
 0x281   : > { %1510 = dma.done.wait (!%p1258_p11), %s1001_s13, 2048  }
 0x282   : > { %1512 = vsyncadd (!%p1258_p11), %s1001_s13, 4294965248  ;;  %s26_s29 = sadd.s32 1, %s1535_s29   ;;  %s2141_s17 = sld [smem:[#allocation12_spill]] }
 0x283   : > { %p23_p1 = scmp.ge.s32.totalorder %s26_s29, 4   ;;  %s2142_s14 = sld [smem:[#allocation11_spill]] }
 0x284   : > { %s2143_s24 = smov %s1519_s25  ;;  %s2144_s25 = smov %s1523_s26 }
 0x285   : > { %s2146_s27 = smov %s1531_s28  ;;  %25 = sbr.rel (!%p23_p1) target bundleno = 10 (0xa), region = 109 }
 0x288   : > { %s2145_s26 = smov %s2141_s17 }
 0x289   : > { %s2147_s28 = smov %s2142_s14 }
 0x28c   :  { %1006 = vsyncpa [#allocation3], 1 }
 0x28d   :  { %1008 = vsyncpa [#allocation3 + $0x1], 1 }
 0x28e   :  { %1009 = vsyncpa [#allocation6], 1 }
 0x28f   :  { %1011 = vsyncpa [#allocation6 + $0x1], 1 }
 0x290   :  { %1012 = vsyncpa [#allocation4], 1 }
 0x291   :  { %1014 = vsyncpa [#allocation4 + $0x1], 1 }

</bundles_post_ra>
